<compile_context>
chip_gen: v5e
topology: v5e:2x2
jax: 0.10.0
libtpu: 0.0.40
codegen_flags: <defaults>
</compile_context>

<pallas_src>
import math

import jax
import jax.numpy as jnp
from jax.experimental import pallas as pl
from jax.experimental.pallas import tpu as pltpu


def gpc_kernel(x_ref, w_ref, b_ref, e_ref, o_ref, xc_ref):
    # x_ref : (bb, C_in, N, N)   native NCHW batch block, x[b, c, i, k]
    # w_ref : (C_in, C_out, N)   conv (1, N) weight, w_ref[c, o, k] = W[o, c, 0, k]
    # b_ref : (C_out, 1)         bias column
    # e_ref : (N, NP)            E[i, p] = [i == p//N] + [i == p%N] (0 in lane pad)
    # o_ref : (bb*C_out, NP)     lane-dense flattened output block
    # xc_ref: (bb*C_out, N)      VMEM scratch: stacked per-sample conv results
    bb, c_in = x_ref.shape[0], x_ref.shape[1]
    c_out = w_ref.shape[1]

    def conv_one_batch(b, carry):
        # xc[b, o, i] = sum_{c,k} W[o,c,k] * x[b,c,i,k] + bias[o]
        acc = jnp.einsum('ok,ik->oi', w_ref[0], x_ref[b, 0],
                         preferred_element_type=jnp.float32)
        for c in range(1, c_in):
            acc = acc + jnp.einsum('ok,ik->oi', w_ref[c], x_ref[b, c],
                                   preferred_element_type=jnp.float32)
        acc = acc + b_ref[...]                      # bias folded into the stack
        row = b * c_out
        if c_out % 8 == 0:
            row = pl.multiple_of(row, 8)            # sublane-aligned store
        xc_ref[pl.ds(row, c_out), :] = acc
        return carry

    jax.lax.fori_loop(0, bb, conv_one_batch, 0)

    # Symmetric broadcast-add as ONE fused matmul per grid step:
    #   out[b*C_out + o, p] = xc[b, o, p//N] + xc[b, o, p%N]
    o_ref[...] = jnp.dot(xc_ref[...], e_ref[...],
                         preferred_element_type=jnp.float32).astype(o_ref.dtype)


def _round_up(v, m):
    return -(-v // m) * m


def _is_megacore():
    """True for chips with 2 TensorCores per device (benefit from >=2 grid steps)."""
    try:
        kind = jax.devices()[0].device_kind.lower()
    except Exception:
        return False
    return any(tag in kind for tag in ("v3", "v4", "v5p", "7"))


def _choose_grid(batch, c_in, c_out, n, np_lanes, two_steps):
    """Pick (num_steps, batch_block): largest bb that fits a conservative VMEM
    budget (amortizes the ~0.35us grid-step overhead); non-divisible batches are
    padded instead of falling back to tiny blocks."""
    # double-buffered per-sample VMEM bytes (f32, (8,128)-tiled in/out blocks)
    per_sample = 4 * 2 * (c_in * _round_up(n, 8) * _round_up(n, 128)
                          + c_out * np_lanes)
    budget = 20 * 1024 * 1024          # headroom for E, W, scratch, dot temps
    max_bb = max(1, min(32, budget // per_sample))
    num_steps = -(-batch // max_bb)
    if two_steps and batch >= 2:       # keep both TensorCores busy on megacore
        num_steps = max(num_steps, 2)
        num_steps += num_steps % 2     # prefer an even number of parallel steps
    bb = -(-batch // num_steps)
    if num_steps > 1:
        while (bb * c_out) % 8:        # output block sublane dim must be 8-aligned
            bb += 1
    return num_steps, bb


def gpc_forward(x, w, b):
    """x: (B, C_in, N, N); w: (C_out, C_in, 1, N); b: (C_out,) -> (B, C_out, N, N)"""
    B, c_in, n, n2 = x.shape
    assert n == n2
    c_out = w.shape[0]
    nn_flat = n * n
    np_lanes = _round_up(nn_flat, 128)            # lane-dense padded output width

    x = x.astype(jnp.float32)
    # Tiny host-side rearranges (weight/bias only -- x stays in native layout).
    w_k = jnp.transpose(w[:, :, 0, :], (1, 0, 2)).astype(jnp.float32)  # (C_in,C_out,N)
    b_col = b.astype(jnp.float32)[:, None]                             # (C_out, 1)

    # E[i, i*N + j] += 1 ; E[j, i*N + j] += 1 (diagonal gets 2); zero lane tail.
    lanes = jnp.arange(n, dtype=jnp.int32)
    p = jnp.arange(np_lanes, dtype=jnp.int32)
    valid = (p < nn_flat)[None, :]
    e = (((lanes[:, None] == (p // n)[None, :]) & valid).astype(jnp.float32)
         + ((lanes[:, None] == (p % n)[None, :]) & valid).astype(jnp.float32))

    num_steps, bb = _choose_grid(B, c_in, c_out, n, np_lanes, _is_megacore())
    b_pad = num_steps * bb
    if b_pad != B:
        x = jnp.pad(x, ((0, b_pad - B), (0, 0), (0, 0), (0, 0)))

    flops = 2 * b_pad * c_out * n * (c_in * n + np_lanes)
    bytes_accessed = 4 * (x.size + w_k.size + b_col.size + e.size
                          + b_pad * c_out * np_lanes)

    out_flat = pl.pallas_call(
        gpc_kernel,
        out_shape=jax.ShapeDtypeStruct((b_pad * c_out, np_lanes), jnp.float32),
        grid=(num_steps,),
        in_specs=[
            pl.BlockSpec((bb, c_in, n, n), lambda s: (s, 0, 0, 0)),
            pl.BlockSpec((c_in, c_out, n), lambda s: (0, 0, 0)),
            pl.BlockSpec((c_out, 1), lambda s: (0, 0)),
            pl.BlockSpec((n, np_lanes), lambda s: (0, 0)),
        ],
        out_specs=pl.BlockSpec((bb * c_out, np_lanes), lambda s: (s, 0)),
        scratch_shapes=[pltpu.VMEM((bb * c_out, n), jnp.float32)],
        compiler_params=pltpu.CompilerParams(
            dimension_semantics=("parallel",),
            vmem_limit_bytes=32 * 1024 * 1024),
        cost_estimate=pl.CostEstimate(flops=flops, transcendentals=0,
                                      bytes_accessed=bytes_accessed),
    )(x, w_k, b_col, e)

    out = out_flat.reshape(b_pad, c_out, np_lanes)[:B, :, :nn_flat]
    return out.reshape(B, c_out, n, n)


def gpc_reference(x, w, b):
    """Pure-JAX reference matching the PyTorch GPC module exactly."""
    xc = jnp.einsum('bcik,ock->boi', x, w[:, :, 0, :]) + b[None, :, None]
    return xc[:, :, :, None] + xc[:, :, None, :]


def init_params(key, in_dim, out_dim, node_dim):
    k1, k2 = jax.random.split(key, 2)
    # nn.init.normal_(weight, std=sqrt(2 / (node_dim*in_dim + node_dim*out_dim)))
    std = math.sqrt(2.0 / (node_dim * in_dim + node_dim * out_dim))
    w = std * jax.random.normal(k1, (out_dim, in_dim, 1, node_dim), jnp.float32)
    # Conv2d default bias init: U(-1/sqrt(fan_in), 1/sqrt(fan_in)), fan_in = in_dim*node_dim
    bound = 1.0 / math.sqrt(in_dim * node_dim)
    b = jax.random.uniform(k2, (out_dim,), jnp.float32, -bound, bound)
    return w, b


if __name__ == "__main__":
    key = jax.random.PRNGKey(0)
    # Two small configs: one tiny, one at the module-default node_dim=53 (exercises
    # the lane-padded output path and batch padding).
    configs = [(2, 4, 8, 16), (5, 3, 8, 53)]
    for cfg_key, (batch, in_dim, out_dim, node_dim) in zip(
            jax.random.split(key, len(configs)), configs):
        kx, kp = jax.random.split(cfg_key)
        x = jax.random.normal(kx, (batch, in_dim, node_dim, node_dim), jnp.float32)
        w, b = init_params(kp, in_dim, out_dim, node_dim)

        out = jax.block_until_ready(gpc_forward(x, w, b))
        ref = gpc_reference(x, w, b)
        assert out.shape == (batch, out_dim, node_dim, node_dim)
        err = jnp.max(jnp.abs(out - ref))
        assert jnp.allclose(out, ref, atol=2e-4, rtol=2e-4), f"max err {err}"
    print("KERNEL_OK")
</pallas_src>

<mosaic_0001>
module attributes {stable_mosaic.version = 11 : i64} {
  func.func @gpc_kernel(%arg0: i32, %arg1: memref<2x4x16x16xf32, #tpu.memory_space<vmem>>, %arg2: memref<4x8x16xf32, #tpu.memory_space<vmem>>, %arg3: memref<8x1xf32, #tpu.memory_space<vmem>>, %arg4: memref<16x256xf32, #tpu.memory_space<vmem>>, %arg5: memref<16x256xf32, #tpu.memory_space<vmem>>, %arg6: memref<16x16xf32, #tpu.memory_space<vmem>>) attributes {dimension_semantics = [#tpu.dimension_semantics<parallel>], iteration_bounds = array<i64: 1>, scalar_prefetch = 0 : i64, scratch_operands = 1 : i64, tpu.core_type = #tpu.core_type<tc>, window_params = [{transform_indices = @transform_0, window_bounds = array<i64: 2, 4, 16, 16>}, {pipeline_mode = #tpu.pipeline_mode<synchronous>, transform_indices = @transform_1, window_bounds = array<i64: 4, 8, 16>}, {pipeline_mode = #tpu.pipeline_mode<synchronous>, transform_indices = @transform_2, window_bounds = array<i64: 8, 1>}, {pipeline_mode = #tpu.pipeline_mode<synchronous>, transform_indices = @transform_3, window_bounds = array<i64: 16, 256>}, {transform_indices = @transform_4, window_bounds = array<i64: 16, 256>}]} {
    %c0_i32 = arith.constant 0 : i32
    %c2_i32 = arith.constant 2 : i32
    %0 = arith.addi %c0_i32, %c2_i32 : i32
    %c1_i32 = arith.constant 1 : i32
    scf.for %arg7 = %c0_i32 to %0 step %c1_i32  : i32 {
      %c0_6 = arith.constant 0 : index
      %c0_7 = arith.constant 0 : index
      %c0_8 = arith.constant 0 : index
      %5 = vector.load %arg2[%c0_6, %c0_7, %c0_8] : memref<4x8x16xf32, #tpu.memory_space<vmem>>, vector<1x8x16xf32>
      %6 = vector.shape_cast %5 : vector<1x8x16xf32> to vector<8x16xf32>
      %7 = arith.index_cast %arg7 : i32 to index
      %c0_9 = arith.constant 0 : index
      %c0_10 = arith.constant 0 : index
      %c0_11 = arith.constant 0 : index
      %8 = vector.load %arg1[%7, %c0_9, %c0_10, %c0_11] : memref<2x4x16x16xf32, #tpu.memory_space<vmem>>, vector<1x1x16x16xf32>
      %9 = vector.shape_cast %8 : vector<1x1x16x16xf32> to vector<16x16xf32>
      "tpu.trace_start"() <{level = 10 : i32, message = "ok,ik->oi"}> : () -> ()
      %cst_12 = arith.constant dense<0.000000e+00> : vector<8x16xf32>
      %10 = tpu.matmul %6, %9, %cst_12 {dimension_numbers = #tpu.dot_dimension_numbers<[1], [1], [0], [0], [0, 0, 1, 0], [], []>} : vector<8x16xf32>, vector<16x16xf32>, vector<8x16xf32> -> vector<8x16xf32>
      "tpu.trace_stop"() : () -> ()
      %c1 = arith.constant 1 : index
      %c0_13 = arith.constant 0 : index
      %c0_14 = arith.constant 0 : index
      %11 = vector.load %arg2[%c1, %c0_13, %c0_14] : memref<4x8x16xf32, #tpu.memory_space<vmem>>, vector<1x8x16xf32>
      %12 = vector.shape_cast %11 : vector<1x8x16xf32> to vector<8x16xf32>
      %13 = arith.index_cast %arg7 : i32 to index
      %c1_15 = arith.constant 1 : index
      %c0_16 = arith.constant 0 : index
      %c0_17 = arith.constant 0 : index
      %14 = vector.load %arg1[%13, %c1_15, %c0_16, %c0_17] : memref<2x4x16x16xf32, #tpu.memory_space<vmem>>, vector<1x1x16x16xf32>
      %15 = vector.shape_cast %14 : vector<1x1x16x16xf32> to vector<16x16xf32>
      "tpu.trace_start"() <{level = 10 : i32, message = "ok,ik->oi"}> : () -> ()
      %cst_18 = arith.constant dense<0.000000e+00> : vector<8x16xf32>
      %16 = tpu.matmul %12, %15, %cst_18 {dimension_numbers = #tpu.dot_dimension_numbers<[1], [1], [0], [0], [0, 0, 1, 0], [], []>} : vector<8x16xf32>, vector<16x16xf32>, vector<8x16xf32> -> vector<8x16xf32>
      "tpu.trace_stop"() : () -> ()
      %17 = arith.addf %10, %16 : vector<8x16xf32>
      %c2 = arith.constant 2 : index
      %c0_19 = arith.constant 0 : index
      %c0_20 = arith.constant 0 : index
      %18 = vector.load %arg2[%c2, %c0_19, %c0_20] : memref<4x8x16xf32, #tpu.memory_space<vmem>>, vector<1x8x16xf32>
      %19 = vector.shape_cast %18 : vector<1x8x16xf32> to vector<8x16xf32>
      %20 = arith.index_cast %arg7 : i32 to index
      %c2_21 = arith.constant 2 : index
      %c0_22 = arith.constant 0 : index
      %c0_23 = arith.constant 0 : index
      %21 = vector.load %arg1[%20, %c2_21, %c0_22, %c0_23] : memref<2x4x16x16xf32, #tpu.memory_space<vmem>>, vector<1x1x16x16xf32>
      %22 = vector.shape_cast %21 : vector<1x1x16x16xf32> to vector<16x16xf32>
      "tpu.trace_start"() <{level = 10 : i32, message = "ok,ik->oi"}> : () -> ()
      %cst_24 = arith.constant dense<0.000000e+00> : vector<8x16xf32>
      %23 = tpu.matmul %19, %22, %cst_24 {dimension_numbers = #tpu.dot_dimension_numbers<[1], [1], [0], [0], [0, 0, 1, 0], [], []>} : vector<8x16xf32>, vector<16x16xf32>, vector<8x16xf32> -> vector<8x16xf32>
      "tpu.trace_stop"() : () -> ()
      %24 = arith.addf %17, %23 : vector<8x16xf32>
      %c3 = arith.constant 3 : index
      %c0_25 = arith.constant 0 : index
      %c0_26 = arith.constant 0 : index
      %25 = vector.load %arg2[%c3, %c0_25, %c0_26] : memref<4x8x16xf32, #tpu.memory_space<vmem>>, vector<1x8x16xf32>
      %26 = vector.shape_cast %25 : vector<1x8x16xf32> to vector<8x16xf32>
      %27 = arith.index_cast %arg7 : i32 to index
      %c3_27 = arith.constant 3 : index
      %c0_28 = arith.constant 0 : index
      %c0_29 = arith.constant 0 : index
      %28 = vector.load %arg1[%27, %c3_27, %c0_28, %c0_29] : memref<2x4x16x16xf32, #tpu.memory_space<vmem>>, vector<1x1x16x16xf32>
      %29 = vector.shape_cast %28 : vector<1x1x16x16xf32> to vector<16x16xf32>
      "tpu.trace_start"() <{level = 10 : i32, message = "ok,ik->oi"}> : () -> ()
      %cst_30 = arith.constant dense<0.000000e+00> : vector<8x16xf32>
      %30 = tpu.matmul %26, %29, %cst_30 {dimension_numbers = #tpu.dot_dimension_numbers<[1], [1], [0], [0], [0, 0, 1, 0], [], []>} : vector<8x16xf32>, vector<16x16xf32>, vector<8x16xf32> -> vector<8x16xf32>
      "tpu.trace_stop"() : () -> ()
      %31 = arith.addf %24, %30 : vector<8x16xf32>
      %c0_31 = arith.constant 0 : index
      %c0_32 = arith.constant 0 : index
      %32 = vector.load %arg3[%c0_31, %c0_32] : memref<8x1xf32, #tpu.memory_space<vmem>>, vector<8x1xf32>
      %33 = vector.broadcast %32 : vector<8x1xf32> to vector<8x16xf32>
      %34 = arith.addf %31, %33 : vector<8x16xf32>
      %c8_i32 = arith.constant 8 : i32
      %35 = arith.muli %arg7, %c8_i32 : i32
      %36 = tpu.assume_multiple %35, 8 : i32
      %37 = arith.index_cast %36 : i32 to index
      %c0_33 = arith.constant 0 : index
      %38 = vector.load %arg6[%37, %c0_33] : memref<16x16xf32, #tpu.memory_space<vmem>>, vector<8x16xf32>
      tpu.vector_store %arg6[%37, %c0_33], %34 {strides = array<i32>} : memref<16x16xf32, #tpu.memory_space<vmem>>, vector<8x16xf32>,
    }
    %c2_i32_0 = arith.constant 2 : i32
    %c0 = arith.constant 0 : index
    %c0_1 = arith.constant 0 : index
    %1 = vector.load %arg6[%c0, %c0_1] : memref<16x16xf32, #tpu.memory_space<vmem>>, vector<16x16xf32>
    %c0_2 = arith.constant 0 : index
    %c0_3 = arith.constant 0 : index
    %2 = vector.load %arg4[%c0_2, %c0_3] : memref<16x256xf32, #tpu.memory_space<vmem>>, vector<16x256xf32>
    %cst = arith.constant dense<0.000000e+00> : vector<16x256xf32>
    %3 = tpu.matmul %1, %2, %cst {dimension_numbers = #tpu.dot_dimension_numbers<[1], [0], [0], [1], [0, 0, 1, 1], [], []>} : vector<16x16xf32>, vector<16x256xf32>, vector<16x256xf32> -> vector<16x256xf32>
    %c0_4 = arith.constant 0 : index
    %c0_5 = arith.constant 0 : index
    %4 = vector.load %arg5[%c0_4, %c0_5] : memref<16x256xf32, #tpu.memory_space<vmem>>, vector<16x256xf32>
    tpu.vector_store %arg5[%c0_4, %c0_5], %3 {strides = array<i32>} : memref<16x256xf32, #tpu.memory_space<vmem>>, vector<16x256xf32>,
    return
  }
  func.func @transform_0(%arg0: i32) -> (i32, i32, i32, i32) {
    %c0_i32 = arith.constant 0 : i32
    %c0_i32_0 = arith.constant 0 : i32
    %c0_i32_1 = arith.constant 0 : i32
    %c0_i32_2 = arith.constant 0 : i32
    return %arg0, %c0_i32, %c0_i32_0, %c0_i32_1 : i32, i32, i32, i32
  }
  func.func @transform_1(%arg0: i32) -> (i32, i32, i32) {
    %c0_i32 = arith.constant 0 : i32
    %c0_i32_0 = arith.constant 0 : i32
    %c0_i32_1 = arith.constant 0 : i32
    %c0_i32_2 = arith.constant 0 : i32
    return %c0_i32, %c0_i32_0, %c0_i32_1 : i32, i32, i32
  }
  func.func @transform_2(%arg0: i32) -> (i32, i32) {
    %c0_i32 = arith.constant 0 : i32
    %c0_i32_0 = arith.constant 0 : i32
    %c0_i32_1 = arith.constant 0 : i32
    return %c0_i32, %c0_i32_0 : i32, i32
  }
  func.func @transform_3(%arg0: i32) -> (i32, i32) {
    %c0_i32 = arith.constant 0 : i32
    %c0_i32_0 = arith.constant 0 : i32
    %c0_i32_1 = arith.constant 0 : i32
    return %c0_i32, %c0_i32_0 : i32, i32
  }
  func.func @transform_4(%arg0: i32) -> (i32, i32) {
    %c0_i32 = arith.constant 0 : i32
    %c0_i32_0 = arith.constant 0 : i32
    return %arg0, %c0_i32 : i32, i32
  }
}

</mosaic_0001>

<bundles_post_ra>
// kernel: tpu_custom_call.1
= control target key start
LH: loop header
LB: loop body
LE: loop exit
PB: predicated region body
PF: predicated region fallthrough
CT: control target
= control target key end

     0   :  { %9 = vsyncpa [#allocation4], 0  ;;  %s565_s0 = inlined_call_operand.hbm [shape: f32[2,4,16,16], index: 0, kind: input, shape index: {}]   ;;  %s566_s1 = inlined_call_operand.hbm [shape: f32[4,8,16], index: 1, kind: input, shape index: {}]   ;;  %s567_s2 = inlined_call_operand.vmem [shape: f32[8,1], index: 2, kind: input, shape index: {}]   ;;  %s568_s3 = inlined_call_operand.hbm [shape: f32[16,256], index: 3, kind: input, shape index: {}]   ;;  %s569_s4 = inlined_call_operand.hbm [shape: f32[16,256], index: 4, kind: output, shape index: {}]  }
   0x1   :  { %10 = vsyncpa [#allocation7], 0 }
   0x2   :  { %11 = vsyncpa [#allocation5], 0  ;;  %s29_s17 = sshll.u32 %s566_s1, 4  ;;  %s483_s18 = smov [#allocation6]   ;;  %s30_s17 = int_to_ptr.hbm [resolvable:$true] %s29_s17 }
   0x3   :  { %s31_s19 = sshll.u32 %s483_s18, 4  ;;  %s16_s22 = sshll.u32 %s565_s0, 4  ;;  %s32_s19 = int_to_ptr.vmem [resolvable:$true] %s31_s19  ;;  %s17_s22 = int_to_ptr.hbm [resolvable:$true] %s16_s22 }
   0x4   :  { %s484_s23 = smov 128   ;;  %s485_s24 = smov 8  }
   0x5   :  { %37 = dma.hbm_to_vmem [thread:$0]  %s30_s17, 512, %s32_s19, [#allocation7], %s484_s23, %s484_s23, %s485_s24  }
   0x6   :  { %s486_s25 = smov [#allocation3]   ;;  %s44_s29 = sshll.u32 %s568_s3, 4  ;;  %s45_s29 = int_to_ptr.hbm [resolvable:$true] %s44_s29 }
   0x7   :  { %s18_s26 = sshll.u32 %s486_s25, 4  ;;  %s487_s1 = smov [#allocation8]   ;;  %s19_s26 = int_to_ptr.vmem [resolvable:$true] %s18_s26 }
   0x8   :  { %24 = dma.hbm_to_vmem [thread:$0]  %s17_s22, 2048, %s19_s26, [#allocation4], %s484_s23, %s484_s23, %s485_s24  }
   0x9   :  { %s46_s30 = sshll.u32 %s487_s1, 4  ;;  %s488_s5 = smov 256   ;;  %s47_s30 = int_to_ptr.vmem [resolvable:$true] %s46_s30 }
   0xa   :  { %s489_s6 = smov 16  }
   0xb   :  { %52 = dma.hbm_to_vmem [thread:$0]  %s45_s29, 512, %s47_s30, [#allocation7], %s488_s5, %s488_s5, %s489_s6  }
   0xc   :  { %473 = dma.done.wait [#allocation4], 2048  }
   0xd   :  { %474 = vsyncadd [#allocation4], 4294965248 }
   0xe   :  { %475 = dma.done.wait [#allocation7], 1024  }
   0xf   :  { %476 = vsyncadd [#allocation7], 4294966272  ;;  %s529_s0 = smov 0  }
  0x10 LB: > { %v490_v0 = vmov 0   ;;  %v213_v1 = vld [vmem:[%s567_s2] sm:$0xff]  ;;  %s324_s8 = sshll.u32 %s481_s0, 6  ;;  %vm82_vm0 = vcmask 130048   ;;  %v178_v11 = vld [vmem:[#allocation6 + $0x18] sm:$0xff]  ;;  %v77_v12 = vld [vmem:[#allocation6 + $0x8] sm:$0xff]  ;;  %s481_s0 = sphi %s529_s0, %s70_s0  }
  0x11   : > { %372 = vset.pattern.permute.xlu0 %v490_v0  ;;  %s73_s9 = scalar_lea.vmem [#allocation3], %s324_s8  ;;  %v142_v10 = vld [vmem:[#allocation6 + $0x10] sm:$0xff]  ;;  %v71_v13 = vld [vmem:[#allocation6] sm:$0xff]  ;;  %s346_s10 = sshll.u32 %s481_s0, 3 }
  0x12   : > { %216 = vperm.xlu0 %372, %v213_v1   ;;  %v336_v2 = vld [vmem:[%s73_s9 + $0x28] sm:$0xff]  ;;  %v342_v3 = vld [vmem:[%s73_s9 + $0x38] sm:$0xff]  ;;  %v335_v6 = vld [vmem:[%s73_s9 + $0x20] sm:$0xff]  ;;  %s221_s11 = scalar_lea.vmem [#allocation2], %s346_s10  ;;  %s70_s0 = sadd.s32 1, %s481_s0  }
  0x13   : > { %v327_v4 = vld [vmem:[%s73_s9 + $0x18] sm:$0xff]  ;;  %337 = vmatpush.xpose.msk.msra.mxu2 %vm82_vm0, %v336_v2  ;;  %343 = vmatpush.xpose.msk.msra.mxu3 %vm82_vm0, %v342_v3  ;;  %v75_v5 = vld [vmem:[%s73_s9 + $0x8] sm:$0xff]  ;;  %v341_v7 = vld [vmem:[%s73_s9 + $0x30] sm:$0xff]  ;;  %p67_p0 = scmp.ge.s32.totalorder %s70_s0, 2  }
  0x14   : > { %328 = vmatpush.xpose.msk.msra.mxu0 %vm82_vm0, %v327_v4  ;;  %331 = vmatpush.xpose.msk.msra.mxu1 %vm82_vm0, %v75_v5  ;;  %v326_v8 = vld [vmem:[%s73_s9 + $0x10] sm:$0xff]  ;;  %v74_v9 = vld [vmem:[%s73_s9] sm:$0xff]  ;;  %v228_v24 = vld [vmem:[#allocation8 + $0x18] sm:$0xff] (%p67_p0)  ;;  %s491_s2 = smov (%p67_p0), [#allocation9]   ;;  %s292_s15 = sshll.u32 (%p67_p0), %s569_s4, 4  ;;  %s293_s15 = int_to_ptr.hbm [resolvable:$true] %s292_s15 }
  0x15   :  { %v227_v23 = vld [vmem:[#allocation8 + $0x10] sm:$0xff] (%p67_p0)  ;;  %v225_v25 = vld [vmem:[#allocation8] sm:$0xff] (%p67_p0)  ;;  %v226_v26 = vld [vmem:[#allocation8 + $0x8] sm:$0xff] (%p67_p0)  ;;  %s290_s12 = sshll.u32 (%p67_p0), %s491_s2, 4  ;;  %s291_s12 = int_to_ptr.vmem [resolvable:$true] %s290_s12 }
  0x17   : > { %338 = vmatpush.xpose.msk.msra.mxu2 %vm82_vm0, %v335_v6  ;;  %344 = vmatpush.xpose.msk.msra.mxu3 %vm82_vm0, %v341_v7 }
  0x18   : > { %329 = vmatpush.xpose.msk.msra.mxu0 %vm82_vm0, %v326_v8  ;;  %332 = vmatpush.xpose.msk.msra.mxu1 %vm82_vm0, %v74_v9 }
  0x1a   : > { %339 = vmatmul.msk.f32.vlgmr.msra.gmra.mxu2 %vm82_vm0, %v142_v10  ;;  %345 = vmatmul.msk.f32.vlgmr.msra.gmra.mxu3 %vm82_vm0, %v178_v11 }
  0x1b   : > { %330 = vmatmul.msk.f32.vlgmr.msra.gmra.mxu0 %vm82_vm0, %v77_v12  ;;  %333 = vmatmul.msk.f32.vlgmr.msra.gmra.mxu1 %vm82_vm0, %v71_v13 }
  0x1c   :  { %351 = vmatpush.msra.mxu2 (%p67_p0), %v227_v23  ;;  %353 = vmatpush.msra.mxu3 (%p67_p0), %v228_v24 }
  0x1d   :  { %250 = vmatpush.msra.mxu0 (%p67_p0), %v227_v23  ;;  %273 = vmatpush.msra.mxu1 (%p67_p0), %v228_v24 }
  0x1e   :  { %352 = vmatpush.msra.mxu2 (%p67_p0), %v225_v25  ;;  %354 = vmatpush.msra.mxu3 (%p67_p0), %v226_v26 }
  0x1f   :  { %251 = vmatpush.msra.mxu0 (%p67_p0), %v225_v25  ;;  %274 = vmatpush.msra.mxu1 (%p67_p0), %v226_v26 }
  0x84   : > { %v217_v20 = vpop.permute.xlu0 %216 }
  0x98   : > { %v109_v14 = vpop.f32.mrf.mxu0  ;;  %v138_v15 = vpop.f32.mrf.mxu1 }
  0x99   : > { %v139_v16 = vadd.f32 %v138_v15, %v109_v14 }
  0x9d   : > { %v173_v17 = vpop.f32.mrf.mxu2  ;;  %v209_v18 = vpop.f32.mrf.mxu3 }
  0x9e   : > { %v176_v19 = vadd.f32 %v173_v17, %v139_v16 }
  0xa0   : > { %v212_v21 = vadd.f32 %v209_v18, %v176_v19  ;;  %69 = sbr.rel (!%p67_p0) target bundleno = 16 (0x10), region = 63 }
  0xa2   : > { %v219_v22 = vadd.f32 %v217_v20, %v212_v21 }
  0xa4   : > { %222 = vst.msk [vmem:[%s221_s11] sm:$0xff] %vm82_vm0, %v219_v22 }
  0xab   :  { %v224_v27 = vld [vmem:[#allocation2 + $0x8] sm:$0xff]  ;;  %v223_v28 = vld [vmem:[#allocation2] sm:$0xff] }
  0xac   :  { %348 = vmatmul.msk.f32.vlgmr.msra.gmra.mxu2 %vm82_vm0, %v224_v27  ;;  %350 = vmatmul.msk.f32.vlgmr.msra.gmra.mxu3 %vm82_vm0, %v224_v27 }
  0xad   :  { %347 = vmatmul.msk.f32.vlgmr.msra.gmra.mxu0 %vm82_vm0, %v223_v28  ;;  %349 = vmatmul.msk.f32.vlgmr.msra.gmra.mxu1 %vm82_vm0, %v223_v28 }
 0x12a   :  { %v253_v29 = vpop.f32.mrf.mxu0  ;;  %v276_v30 = vpop.f32.mrf.mxu1 }
 0x12b   :  { %282 = vst [vmem:[#allocation9] sm:$0xff] %v253_v29 }
 0x12c   :  { %283 = vst [vmem:[#allocation9 + $0x8] sm:$0xff] %v276_v30 }
 0x12f   :  { %v256_v31 = vpop.f32.mrf.mxu2  ;;  %v279_v32 = vpop.f32.mrf.mxu3 }
 0x130   :  { %284 = vst [vmem:[#allocation9 + $0x10] sm:$0xff] %v256_v31 }
 0x131   :  { %285 = vst [vmem:[#allocation9 + $0x18] sm:$0xff] %v279_v32 }
 0x132   :  { %298 = dma.vmem_to_hbm [thread:$0]  %s291_s12, 512, %s293_s15, [#allocation5], %s488_s5, %s488_s5, %s489_s6  }
 0x133   :  { %477 = dma.done.wait [#allocation5], 512  }
 0x134   :  { %478 = vsyncadd [#allocation5], 4294966784 }
 0x135   :  { %303 = vsyncpa [#allocation4], 1 }
 0x136   :  { %304 = vsyncpa [#allocation7], 1 }
 0x137   :  { %305 = vsyncpa [#allocation5], 1 }

</bundles_post_ra>
